<compile_context>
chip_gen: v5e
topology: v5e:2x2
jax: 0.10.0
libtpu: 0.0.40
codegen_flags: <defaults>
</compile_context>

<pallas_src>
import functools

import jax
import jax.numpy as jnp
from jax import lax
from jax.experimental import pallas as pl
from jax.experimental.pallas import tpu as pltpu

# ---------------------------------------------------------------------------
# Problem sizes (consistent with the module: grid 16x16, window 8)
# ---------------------------------------------------------------------------
G0, G1 = 16, 16            # grid_size
W = 8                      # window_size
NPIX = G0 * G1             # 256
NWIN = W * W               # 64
SCALE = float(G0 - W)      # 8.0
W_SHIFT = W.bit_length() - 1     # 3   (W  == 8,  power of two)
G1_SHIFT = G1.bit_length() - 1   # 4   (G1 == 16, power of two)


def _full_spec(shape):
    """BlockSpec covering the whole (small) array as a single block."""
    nd = len(shape)
    return pl.BlockSpec(shape, lambda i, _nd=nd: (0,) * _nd)


# ---------------------------------------------------------------------------
# Fused Pallas kernel
# ---------------------------------------------------------------------------
def _fused_kernel(env_ref, memo_param_ref,
                  obs_wx_ref, obs_wy_ref, obs_bx_ref, obs_by_ref,
                  pl_w_ref, pl_b_ref,
                  memo_out_ref, pf_out_ref, x_out_ref, y_out_ref):
    env = env_ref[...]                                            # (1, 256) f32

    # ---- observer: two VPU dot products (no 128-wide MXU padding needed) ----
    zx = jnp.sum(env * obs_wx_ref[...], axis=1, keepdims=True) + obs_bx_ref[...]
    zy = jnp.sum(env * obs_wy_ref[...], axis=1, keepdims=True) + obs_by_ref[...]
    x_f = jnp.round(jnp.maximum(zx, 0.0) * SCALE)                 # (1, 1)
    y_f = jnp.round(jnp.maximum(zy, 0.0) * SCALE)                 # (1, 1)
    x_i = x_f.astype(jnp.int32)
    y_i = y_f.astype(jnp.int32)
    x_out_ref[...] = x_i                                          # raw (unclamped) ints
    y_out_ref[...] = y_i

    # clamp for indexing (lax.dynamic_slice-style behaviour)
    x_c = jnp.clip(x_i, 0, G0 - W)                                # (1, 1) i32
    y_c = jnp.clip(y_i, 0, G1 - W)
    base = x_c * G1 + y_c                                         # flat index of window origin

    # ---- gather the WxW window as a flat (1, 64) row via a one-hot matmul ----
    p_g = lax.broadcasted_iota(jnp.int32, (NPIX, NWIN), 0)        # env flat index
    q_g = lax.broadcasted_iota(jnp.int32, (NPIX, NWIN), 1)        # window flat index
    off_g = (q_g >> W_SHIFT) * G1 + (q_g & (W - 1))               # window offset in env
    gathermat = jnp.where(p_g == base + off_g, 1.0, 0.0)          # (256, 64) f32
    win = jnp.dot(env, gathermat, preferred_element_type=jnp.float32)   # (1, 64)

    # ---- planter: round(sigmoid(Linear(64 -> 64))) ----
    z = jnp.dot(win, pl_w_ref[...], preferred_element_type=jnp.float32) + pl_b_ref[...]
    pf = jnp.round(jax.nn.sigmoid(z))                             # (1, 64)
    pf_out_ref[...] = pf

    # ---- memoize + scatter: memo = env * memoized_env ; memo[window] = pf ----
    q_s = lax.broadcasted_iota(jnp.int32, (NWIN, NPIX), 0)
    p_s = lax.broadcasted_iota(jnp.int32, (NWIN, NPIX), 1)
    off_s = (q_s >> W_SHIFT) * G1 + (q_s & (W - 1))
    scattermat = jnp.where(p_s == base + off_s, 1.0, 0.0)         # (64, 256)
    pf_scatter = jnp.dot(pf, scattermat, preferred_element_type=jnp.float32)  # (1, 256)

    p_m = lax.broadcasted_iota(jnp.int32, (1, NPIX), 1)
    row = p_m >> G1_SHIFT
    col = p_m & (G1 - 1)
    in_win = (row >= x_c) & (row < x_c + W) & (col >= y_c) & (col < y_c + W)
    memo = env * memo_param_ref[...]
    memo_out_ref[...] = jnp.where(in_win, pf_scatter, memo)


def _call_fused(env_flat, memo_flat, obs_wx, obs_wy, obs_bx, obs_by, pl_w_t, pl_b_row):
    flops = 2 * (2 * NPIX + NPIX * NWIN + NWIN * NWIN + NWIN * NPIX)
    bytes_accessed = 4 * (NPIX + NPIX + 2 * NPIX + 2 + NWIN * NWIN + NWIN
                          + NPIX + NWIN + 2)
    return pl.pallas_call(
        _fused_kernel,
        out_shape=(
            jax.ShapeDtypeStruct((1, NPIX), jnp.float32),   # memoized env (flat)
            jax.ShapeDtypeStruct((1, NWIN), jnp.float32),   # perception field (flat)
            jax.ShapeDtypeStruct((1, 1), jnp.int32),        # x0
            jax.ShapeDtypeStruct((1, 1), jnp.int32),        # y0
        ),
        grid=(1,),
        in_specs=[_full_spec((1, NPIX)),
                  _full_spec((1, NPIX)),
                  _full_spec((1, NPIX)),
                  _full_spec((1, NPIX)),
                  _full_spec((1, 1)),
                  _full_spec((1, 1)),
                  _full_spec((NWIN, NWIN)),
                  _full_spec((1, NWIN))],
        out_specs=(_full_spec((1, NPIX)),
                   _full_spec((1, NWIN)),
                   _full_spec((1, 1)),
                   _full_spec((1, 1))),
        compiler_params=pltpu.CompilerParams(dimension_semantics=("arbitrary",)),
        cost_estimate=pl.CostEstimate(flops=flops, transcendentals=NWIN,
                                      bytes_accessed=bytes_accessed),
    )(env_flat, memo_flat, obs_wx, obs_wy, obs_bx, obs_by, pl_w_t, pl_b_row)


# ---------------------------------------------------------------------------
# Deterministic parameter init (mirrors torch.nn.Linear default U(-1/sqrt(in), 1/sqrt(in)))
# All layout prep (transpose / split / reshape) is done ONCE here, not per forward.
# ---------------------------------------------------------------------------
def init_params(key):
    k1, k2, k3, k4 = jax.random.split(key, 4)
    obs_bound = 1.0 / (NPIX ** 0.5)
    pl_bound = 1.0 / (NWIN ** 0.5)
    obs_w = jax.random.uniform(k1, (2, NPIX), jnp.float32, -obs_bound, obs_bound)
    obs_b = jax.random.uniform(k2, (2,), jnp.float32, -obs_bound, obs_bound)
    pl_w = jax.random.uniform(k3, (NWIN, NWIN), jnp.float32, -pl_bound, pl_bound)
    pl_b = jax.random.uniform(k4, (NWIN,), jnp.float32, -pl_bound, pl_bound)
    return {
        "obs_wx": obs_w[0:1, :],                 # (1, 256) row for x output
        "obs_wy": obs_w[1:2, :],                 # (1, 256) row for y output
        "obs_bx": obs_b[0].reshape(1, 1),        # (1, 1)
        "obs_by": obs_b[1].reshape(1, 1),        # (1, 1)
        "pl_w_t": pl_w.T,                        # (64, 64): x @ W^T layout
        "pl_b_row": pl_b.reshape(1, NWIN),       # (1, 64)
        "memoized_env": jnp.zeros((G0, G1), jnp.float32),
    }


# ---------------------------------------------------------------------------
# Forward pass: one fused Pallas kernel + trivial (1 KiB) reshapes outside
# ---------------------------------------------------------------------------
@jax.jit
def forward(params, env):
    env_flat = env.reshape(1, NPIX)
    memo_flat = params["memoized_env"].reshape(1, NPIX)
    memo_out, pf_out, x_out, y_out = _call_fused(
        env_flat, memo_flat,
        params["obs_wx"], params["obs_wy"], params["obs_bx"], params["obs_by"],
        params["pl_w_t"], params["pl_b_row"])
    memoized_env = memo_out.reshape(G0, G1)
    perception_field = pf_out.reshape(W, W)
    return memoized_env, perception_field, x_out[0, 0], y_out[0, 0]


# ---------------------------------------------------------------------------
# Pure-JAX reference (same clamped-indexing semantics), for a sanity check
# ---------------------------------------------------------------------------
@jax.jit
def _reference(params, env):
    env_flat = env.reshape(-1)
    zx = jnp.maximum(jnp.dot(env_flat, params["obs_wx"][0]) + params["obs_bx"][0, 0], 0.0)
    zy = jnp.maximum(jnp.dot(env_flat, params["obs_wy"][0]) + params["obs_by"][0, 0], 0.0)
    x0 = jnp.round(zx * SCALE).astype(jnp.int32)
    y0 = jnp.round(zy * SCALE).astype(jnp.int32)
    xc = jnp.clip(x0, 0, G0 - W)
    yc = jnp.clip(y0, 0, G1 - W)
    window = lax.dynamic_slice(env, (xc, yc), (W, W))
    pf = jnp.round(jax.nn.sigmoid(window.reshape(-1) @ params["pl_w_t"]
                                  + params["pl_b_row"][0])).reshape(W, W)
    memo = env * params["memoized_env"]
    memo = lax.dynamic_update_slice(memo, pf, (xc, yc))
    return memo, pf, x0, y0


# ---------------------------------------------------------------------------
if __name__ == "__main__":
    key = jax.random.PRNGKey(0)
    pkey, ekey = jax.random.split(key)
    params = init_params(pkey)
    env = jax.random.uniform(ekey, (G0, G1), jnp.float32)

    memoized_env, perception_field, x0, y0 = forward(params, env)
    jax.block_until_ready((memoized_env, perception_field, x0, y0))

    assert memoized_env.shape == (G0, G1) and memoized_env.dtype == jnp.float32
    assert perception_field.shape == (W, W) and perception_field.dtype == jnp.float32
    assert x0.dtype == jnp.int32 and y0.dtype == jnp.int32

    memo_r, pf_r, x_r, y_r = _reference(params, env)
    jax.block_until_ready((memo_r, pf_r, x_r, y_r))
    assert int(x0) == int(x_r) and int(y0) == int(y_r)
    assert jnp.allclose(perception_field, pf_r, atol=1e-5)
    assert jnp.allclose(memoized_env, memo_r, atol=1e-5)

    print("KERNEL_OK")
</pallas_src>

<mosaic_0001>
module attributes {stable_mosaic.version = 11 : i64} {
  func.func @_fused_kernel(%arg0: i32, %arg1: memref<1x256xf32, #tpu.memory_space<vmem>>, %arg2: memref<1x256xf32, #tpu.memory_space<vmem>>, %arg3: memref<1x256xf32, #tpu.memory_space<vmem>>, %arg4: memref<1x256xf32, #tpu.memory_space<vmem>>, %arg5: memref<1x1xf32, #tpu.memory_space<vmem>>, %arg6: memref<1x1xf32, #tpu.memory_space<vmem>>, %arg7: memref<64x64xf32, #tpu.memory_space<vmem>>, %arg8: memref<1x64xf32, #tpu.memory_space<vmem>>, %arg9: memref<1x256xf32, #tpu.memory_space<vmem>>, %arg10: memref<1x64xf32, #tpu.memory_space<vmem>>, %arg11: memref<1x1xi32, #tpu.memory_space<vmem>>, %arg12: memref<1x1xi32, #tpu.memory_space<vmem>>) attributes {dimension_semantics = [#tpu.dimension_semantics<arbitrary>], iteration_bounds = array<i64: 1>, scalar_prefetch = 0 : i64, scratch_operands = 0 : i64, tpu.core_type = #tpu.core_type<tc>, window_params = [{pipeline_mode = #tpu.pipeline_mode<synchronous>, transform_indices = @transform_0, window_bounds = array<i64: 1, 256>}, {pipeline_mode = #tpu.pipeline_mode<synchronous>, transform_indices = @transform_1, window_bounds = array<i64: 1, 256>}, {pipeline_mode = #tpu.pipeline_mode<synchronous>, transform_indices = @transform_2, window_bounds = array<i64: 1, 256>}, {pipeline_mode = #tpu.pipeline_mode<synchronous>, transform_indices = @transform_3, window_bounds = array<i64: 1, 256>}, {pipeline_mode = #tpu.pipeline_mode<synchronous>, transform_indices = @transform_4, window_bounds = array<i64: 1, 1>}, {pipeline_mode = #tpu.pipeline_mode<synchronous>, transform_indices = @transform_5, window_bounds = array<i64: 1, 1>}, {pipeline_mode = #tpu.pipeline_mode<synchronous>, transform_indices = @transform_6, window_bounds = array<i64: 64, 64>}, {pipeline_mode = #tpu.pipeline_mode<synchronous>, transform_indices = @transform_7, window_bounds = array<i64: 1, 64>}, {pipeline_mode = #tpu.pipeline_mode<synchronous>, transform_indices = @transform_8, window_bounds = array<i64: 1, 256>}, {pipeline_mode = #tpu.pipeline_mode<synchronous>, transform_indices = @transform_9, window_bounds = array<i64: 1, 64>}, {pipeline_mode = #tpu.pipeline_mode<synchronous>, transform_indices = @transform_10, window_bounds = array<i64: 1, 1>}, {pipeline_mode = #tpu.pipeline_mode<synchronous>, transform_indices = @transform_11, window_bounds = array<i64: 1, 1>}]} {
    %c0 = arith.constant 0 : index
    %c0_0 = arith.constant 0 : index
    %0 = vector.load %arg1[%c0, %c0_0] : memref<1x256xf32, #tpu.memory_space<vmem>>, vector<1x256xf32>
    %c0_1 = arith.constant 0 : index
    %c0_2 = arith.constant 0 : index
    %1 = vector.load %arg3[%c0_1, %c0_2] : memref<1x256xf32, #tpu.memory_space<vmem>>, vector<1x256xf32>
    %2 = arith.mulf %0, %1 : vector<1x256xf32>
    %cst = arith.constant dense<0.000000e+00> : vector<1xf32>
    %3 = vector.multi_reduction <add>, %2, %cst [1] : vector<1x256xf32> to vector<1xf32>
    %4 = vector.shape_cast %3 : vector<1xf32> to vector<1x1xf32>
    %c0_3 = arith.constant 0 : index
    %c0_4 = arith.constant 0 : index
    %5 = vector.load %arg5[%c0_3, %c0_4] : memref<1x1xf32, #tpu.memory_space<vmem>>, vector<1x1xf32>
    %6 = arith.addf %4, %5 : vector<1x1xf32>
    %c0_5 = arith.constant 0 : index
    %c0_6 = arith.constant 0 : index
    %7 = vector.load %arg4[%c0_5, %c0_6] : memref<1x256xf32, #tpu.memory_space<vmem>>, vector<1x256xf32>
    %8 = arith.mulf %0, %7 : vector<1x256xf32>
    %cst_7 = arith.constant dense<0.000000e+00> : vector<1xf32>
    %9 = vector.multi_reduction <add>, %8, %cst_7 [1] : vector<1x256xf32> to vector<1xf32>
    %10 = vector.shape_cast %9 : vector<1xf32> to vector<1x1xf32>
    %c0_8 = arith.constant 0 : index
    %c0_9 = arith.constant 0 : index
    %11 = vector.load %arg6[%c0_8, %c0_9] : memref<1x1xf32, #tpu.memory_space<vmem>>, vector<1x1xf32>
    %12 = arith.addf %10, %11 : vector<1x1xf32>
    %cst_10 = arith.constant 0.000000e+00 : f32
    %13 = vector.broadcast %cst_10 : f32 to vector<1x1xf32>
    %14 = arith.maximumf %6, %13 : vector<1x1xf32>
    %cst_11 = arith.constant 8.000000e+00 : f32
    %15 = vector.broadcast %cst_11 : f32 to vector<1x1xf32>
    %16 = arith.mulf %14, %15 : vector<1x1xf32>
    %17 = math.roundeven %16 : vector<1x1xf32>
    %cst_12 = arith.constant 0.000000e+00 : f32
    %18 = vector.broadcast %cst_12 : f32 to vector<1x1xf32>
    %19 = arith.maximumf %12, %18 : vector<1x1xf32>
    %cst_13 = arith.constant 8.000000e+00 : f32
    %20 = vector.broadcast %cst_13 : f32 to vector<1x1xf32>
    %21 = arith.mulf %19, %20 : vector<1x1xf32>
    %22 = math.roundeven %21 : vector<1x1xf32>
    %23 = arith.fptosi %17 : vector<1x1xf32> to vector<1x1xi32>
    %24 = arith.fptosi %22 : vector<1x1xf32> to vector<1x1xi32>
    %c0_14 = arith.constant 0 : index
    %c0_15 = arith.constant 0 : index
    %25 = vector.load %arg11[%c0_14, %c0_15] : memref<1x1xi32, #tpu.memory_space<vmem>>, vector<1x1xi32>
    tpu.vector_store %arg11[%c0_14, %c0_15], %23 {strides = array<i32>} : memref<1x1xi32, #tpu.memory_space<vmem>>, vector<1x1xi32>,
    %c0_16 = arith.constant 0 : index
    %c0_17 = arith.constant 0 : index
    %26 = vector.load %arg12[%c0_16, %c0_17] : memref<1x1xi32, #tpu.memory_space<vmem>>, vector<1x1xi32>
    tpu.vector_store %arg12[%c0_16, %c0_17], %24 {strides = array<i32>} : memref<1x1xi32, #tpu.memory_space<vmem>>, vector<1x1xi32>,
    %c0_i32 = arith.constant 0 : i32
    %c8_i32 = arith.constant 8 : i32
    %27 = vector.broadcast %c0_i32 : i32 to vector<1x1xi32>
    %28 = arith.maxsi %27, %23 : vector<1x1xi32>
    %29 = vector.broadcast %c8_i32 : i32 to vector<1x1xi32>
    %30 = arith.minsi %29, %28 : vector<1x1xi32>
    %c0_i32_18 = arith.constant 0 : i32
    %c8_i32_19 = arith.constant 8 : i32
    %31 = vector.broadcast %c0_i32_18 : i32 to vector<1x1xi32>
    %32 = arith.maxsi %31, %24 : vector<1x1xi32>
    %33 = vector.broadcast %c8_i32_19 : i32 to vector<1x1xi32>
    %34 = arith.minsi %33, %32 : vector<1x1xi32>
    %c16_i32 = arith.constant 16 : i32
    %35 = vector.broadcast %c16_i32 : i32 to vector<1x1xi32>
    %36 = arith.muli %30, %35 : vector<1x1xi32>
    %37 = arith.addi %36, %34 : vector<1x1xi32>
    %38 = tpu.iota {dimensions = array<i32: 0>} : vector<256x64xi32>
    %39 = tpu.iota {dimensions = array<i32: 1>} : vector<256x64xi32>
    %c3_i32 = arith.constant 3 : i32
    %40 = vector.broadcast %c3_i32 : i32 to vector<256x64xi32>
    %41 = arith.shrsi %39, %40 : vector<256x64xi32>
    %c16_i32_20 = arith.constant 16 : i32
    %42 = vector.broadcast %c16_i32_20 : i32 to vector<256x64xi32>
    %43 = arith.muli %41, %42 : vector<256x64xi32>
    %c7_i32 = arith.constant 7 : i32
    %44 = vector.broadcast %c7_i32 : i32 to vector<256x64xi32>
    %45 = arith.andi %39, %44 : vector<256x64xi32>
    %46 = arith.addi %43, %45 : vector<256x64xi32>
    %47 = vector.broadcast %37 : vector<1x1xi32> to vector<256x64xi32>
    %48 = arith.addi %47, %46 : vector<256x64xi32>
    %49 = arith.cmpi eq, %38, %48 : vector<256x64xi32>
    %cst_21 = arith.constant 1.000000e+00 : f32
    %cst_22 = arith.constant 0.000000e+00 : f32
    %50 = vector.broadcast %cst_21 : f32 to vector<256x64xf32>
    %51 = vector.broadcast %cst_22 : f32 to vector<256x64xf32>
    %52 = arith.select %49, %50, %51 : vector<256x64xi1>, vector<256x64xf32>
    %cst_23 = arith.constant dense<0.000000e+00> : vector<1x64xf32>
    %53 = tpu.matmul %0, %52, %cst_23 {dimension_numbers = #tpu.dot_dimension_numbers<[1], [0], [0], [1], [0, 0, 1, 1], [], []>} : vector<1x256xf32>, vector<256x64xf32>, vector<1x64xf32> -> vector<1x64xf32>
    %c0_24 = arith.constant 0 : index
    %c0_25 = arith.constant 0 : index
    %54 = vector.load %arg7[%c0_24, %c0_25] : memref<64x64xf32, #tpu.memory_space<vmem>>, vector<64x64xf32>
    %cst_26 = arith.constant dense<0.000000e+00> : vector<1x64xf32>
    %55 = tpu.matmul %53, %54, %cst_26 {dimension_numbers = #tpu.dot_dimension_numbers<[1], [0], [0], [1], [0, 0, 1, 1], [], []>} : vector<1x64xf32>, vector<64x64xf32>, vector<1x64xf32> -> vector<1x64xf32>
    %c0_27 = arith.constant 0 : index
    %c0_28 = arith.constant 0 : index
    %56 = vector.load %arg8[%c0_27, %c0_28] : memref<1x64xf32, #tpu.memory_space<vmem>>, vector<1x64xf32>
    %57 = arith.addf %55, %56 : vector<1x64xf32>
    %58 = arith.negf %57 : vector<1x64xf32>
    %59 = math.exp %58 : vector<1x64xf32>
    %cst_29 = arith.constant 1.000000e+00 : f32
    %60 = vector.broadcast %cst_29 : f32 to vector<1x64xf32>
    %61 = arith.addf %60, %59 : vector<1x64xf32>
    %62 = arith.divf %60, %61 : vector<1x64xf32>
    %63 = math.roundeven %62 : vector<1x64xf32>
    %c0_30 = arith.constant 0 : index
    %c0_31 = arith.constant 0 : index
    %64 = vector.load %arg10[%c0_30, %c0_31] : memref<1x64xf32, #tpu.memory_space<vmem>>, vector<1x64xf32>
    tpu.vector_store %arg10[%c0_30, %c0_31], %63 {strides = array<i32>} : memref<1x64xf32, #tpu.memory_space<vmem>>, vector<1x64xf32>,
    %65 = tpu.iota {dimensions = array<i32: 0>} : vector<64x256xi32>
    %66 = tpu.iota {dimensions = array<i32: 1>} : vector<64x256xi32>
    %c3_i32_32 = arith.constant 3 : i32
    %67 = vector.broadcast %c3_i32_32 : i32 to vector<64x256xi32>
    %68 = arith.shrsi %65, %67 : vector<64x256xi32>
    %c16_i32_33 = arith.constant 16 : i32
    %69 = vector.broadcast %c16_i32_33 : i32 to vector<64x256xi32>
    %70 = arith.muli %68, %69 : vector<64x256xi32>
    %c7_i32_34 = arith.constant 7 : i32
    %71 = vector.broadcast %c7_i32_34 : i32 to vector<64x256xi32>
    %72 = arith.andi %65, %71 : vector<64x256xi32>
    %73 = arith.addi %70, %72 : vector<64x256xi32>
    %74 = vector.broadcast %37 : vector<1x1xi32> to vector<64x256xi32>
    %75 = arith.addi %74, %73 : vector<64x256xi32>
    %76 = arith.cmpi eq, %66, %75 : vector<64x256xi32>
    %cst_35 = arith.constant 1.000000e+00 : f32
    %cst_36 = arith.constant 0.000000e+00 : f32
    %77 = vector.broadcast %cst_35 : f32 to vector<64x256xf32>
    %78 = vector.broadcast %cst_36 : f32 to vector<64x256xf32>
    %79 = arith.select %76, %77, %78 : vector<64x256xi1>, vector<64x256xf32>
    %cst_37 = arith.constant dense<0.000000e+00> : vector<1x256xf32>
    %80 = tpu.matmul %63, %79, %cst_37 {dimension_numbers = #tpu.dot_dimension_numbers<[1], [0], [0], [1], [0, 0, 1, 1], [], []>} : vector<1x64xf32>, vector<64x256xf32>, vector<1x256xf32> -> vector<1x256xf32>
    %81 = tpu.iota {dimensions = array<i32: 1>} : vector<1x256xi32>
    %c4_i32 = arith.constant 4 : i32
    %82 = vector.broadcast %c4_i32 : i32 to vector<1x256xi32>
    %83 = arith.shrsi %81, %82 : vector<1x256xi32>
    %c15_i32 = arith.constant 15 : i32
    %84 = vector.broadcast %c15_i32 : i32 to vector<1x256xi32>
    %85 = arith.andi %81, %84 : vector<1x256xi32>
    %86 = vector.broadcast %30 : vector<1x1xi32> to vector<1x256xi32>
    %87 = arith.cmpi sge, %83, %86 : vector<1x256xi32>
    %c8_i32_38 = arith.constant 8 : i32
    %88 = vector.broadcast %c8_i32_38 : i32 to vector<1x1xi32>
    %89 = arith.addi %30, %88 : vector<1x1xi32>
    %90 = vector.broadcast %89 : vector<1x1xi32> to vector<1x256xi32>
    %91 = arith.cmpi slt, %83, %90 : vector<1x256xi32>
    %92 = arith.andi %87, %91 : vector<1x256xi1>
    %93 = vector.broadcast %34 : vector<1x1xi32> to vector<1x256xi32>
    %94 = arith.cmpi sge, %85, %93 : vector<1x256xi32>
    %95 = arith.andi %92, %94 : vector<1x256xi1>
    %c8_i32_39 = arith.constant 8 : i32
    %96 = vector.broadcast %c8_i32_39 : i32 to vector<1x1xi32>
    %97 = arith.addi %34, %96 : vector<1x1xi32>
    %98 = vector.broadcast %97 : vector<1x1xi32> to vector<1x256xi32>
    %99 = arith.cmpi slt, %85, %98 : vector<1x256xi32>
    %100 = arith.andi %95, %99 : vector<1x256xi1>
    %c0_40 = arith.constant 0 : index
    %c0_41 = arith.constant 0 : index
    %101 = vector.load %arg2[%c0_40, %c0_41] : memref<1x256xf32, #tpu.memory_space<vmem>>, vector<1x256xf32>
    %102 = arith.mulf %0, %101 : vector<1x256xf32>
    %103 = arith.select %100, %80, %102 : vector<1x256xi1>, vector<1x256xf32>
    %c0_42 = arith.constant 0 : index
    %c0_43 = arith.constant 0 : index
    %104 = vector.load %arg9[%c0_42, %c0_43] : memref<1x256xf32, #tpu.memory_space<vmem>>, vector<1x256xf32>
    tpu.vector_store %arg9[%c0_42, %c0_43], %103 {strides = array<i32>} : memref<1x256xf32, #tpu.memory_space<vmem>>, vector<1x256xf32>,
    return
  }
  func.func @transform_0(%arg0: i32) -> (i32, i32) {
    %c0_i32 = arith.constant 0 : i32
    %c0_i32_0 = arith.constant 0 : i32
    %c0_i32_1 = arith.constant 0 : i32
    return %c0_i32, %c0_i32_0 : i32, i32
  }
  func.func @transform_1(%arg0: i32) -> (i32, i32) {
    %c0_i32 = arith.constant 0 : i32
    %c0_i32_0 = arith.constant 0 : i32
    %c0_i32_1 = arith.constant 0 : i32
    return %c0_i32, %c0_i32_0 : i32, i32
  }
  func.func @transform_2(%arg0: i32) -> (i32, i32) {
    %c0_i32 = arith.constant 0 : i32
    %c0_i32_0 = arith.constant 0 : i32
    %c0_i32_1 = arith.constant 0 : i32
    return %c0_i32, %c0_i32_0 : i32, i32
  }
  func.func @transform_3(%arg0: i32) -> (i32, i32) {
    %c0_i32 = arith.constant 0 : i32
    %c0_i32_0 = arith.constant 0 : i32
    %c0_i32_1 = arith.constant 0 : i32
    return %c0_i32, %c0_i32_0 : i32, i32
  }
  func.func @transform_4(%arg0: i32) -> (i32, i32) {
    %c0_i32 = arith.constant 0 : i32
    %c0_i32_0 = arith.constant 0 : i32
    %c0_i32_1 = arith.constant 0 : i32
    return %c0_i32, %c0_i32_0 : i32, i32
  }
  func.func @transform_5(%arg0: i32) -> (i32, i32) {
    %c0_i32 = arith.constant 0 : i32
    %c0_i32_0 = arith.constant 0 : i32
    %c0_i32_1 = arith.constant 0 : i32
    return %c0_i32, %c0_i32_0 : i32, i32
  }
  func.func @transform_6(%arg0: i32) -> (i32, i32) {
    %c0_i32 = arith.constant 0 : i32
    %c0_i32_0 = arith.constant 0 : i32
    %c0_i32_1 = arith.constant 0 : i32
    return %c0_i32, %c0_i32_0 : i32, i32
  }
  func.func @transform_7(%arg0: i32) -> (i32, i32) {
    %c0_i32 = arith.constant 0 : i32
    %c0_i32_0 = arith.constant 0 : i32
    %c0_i32_1 = arith.constant 0 : i32
    return %c0_i32, %c0_i32_0 : i32, i32
  }
  func.func @transform_8(%arg0: i32) -> (i32, i32) {
    %c0_i32 = arith.constant 0 : i32
    %c0_i32_0 = arith.constant 0 : i32
    %c0_i32_1 = arith.constant 0 : i32
    return %c0_i32, %c0_i32_0 : i32, i32
  }
  func.func @transform_9(%arg0: i32) -> (i32, i32) {
    %c0_i32 = arith.constant 0 : i32
    %c0_i32_0 = arith.constant 0 : i32
    %c0_i32_1 = arith.constant 0 : i32
    return %c0_i32, %c0_i32_0 : i32, i32
  }
  func.func @transform_10(%arg0: i32) -> (i32, i32) {
    %c0_i32 = arith.constant 0 : i32
    %c0_i32_0 = arith.constant 0 : i32
    %c0_i32_1 = arith.constant 0 : i32
    return %c0_i32, %c0_i32_0 : i32, i32
  }
  func.func @transform_11(%arg0: i32) -> (i32, i32) {
    %c0_i32 = arith.constant 0 : i32
    %c0_i32_0 = arith.constant 0 : i32
    %c0_i32_1 = arith.constant 0 : i32
    return %c0_i32, %c0_i32_0 : i32, i32
  }
}

</mosaic_0001>

<bundles_post_ra>
// kernel: forward.1
= control target key start
LH: loop header
LB: loop body
LE: loop exit
PB: predicated region body
PF: predicated region fallthrough
CT: control target
= control target key end

     0   :  { %s990_s0 = inlined_call_operand.vmem [shape: f32[1,256], index: 0, kind: input, shape index: {}]   ;;  %s991_s1 = inlined_call_operand.vmem [shape: f32[1,256], index: 1, kind: input, shape index: {}]   ;;  %s992_s2 = inlined_call_operand.vmem [shape: f32[1,256], index: 2, kind: input, shape index: {}]   ;;  %s993_s3 = inlined_call_operand.vmem [shape: f32[1,256], index: 3, kind: input, shape index: {}]   ;;  %s994_s4 = inlined_call_operand.<no memory space> [shape: f32[1,1], index: 4, kind: input, shape index: {}]   ;;  %s995_s6 = inlined_call_operand.hbm [shape: f32[64,64], index: 6, kind: input, shape index: {}]   ;;  %s996_s7 = inlined_call_operand.vmem [shape: f32[1,64], index: 7, kind: input, shape index: {}]   ;;  %s997_s8 = inlined_call_operand.vmem [shape: f32[1,256], index: 8, kind: output, shape index: {0}]   ;;  %s998_s9 = inlined_call_operand.vmem [shape: f32[1,64], index: 9, kind: output, shape index: {1}]   ;;  %s999_s10 = inlined_call_operand.hbm [shape: s32[1,1], index: 10, kind: output, shape index: {2}]   ;;  %s1000_s11 = inlined_call_operand.hbm [shape: s32[1,1], index: 11, kind: output, shape index: {3}]   ;;  %s1001_s5 = inlined_call_operand.<no memory space> [shape: f32[1,1], index: 5, kind: input, shape index: {}]  }
   0x1   :  { %v17_v0 = vstv %s994_s4  ;;  %v19_v1 = vstv %s1001_s5 }
   0x2   :  { %18 = vst [vmem:[#allocation2] sm:$0x1] %v17_v0 }
   0x3   :  { %20 = vst [vmem:[#allocation3] sm:$0x1] %v19_v1 }
   0x4   :  { %21 = vsyncpa [#allocation5], 0 }
   0x5   :  { %22 = vsyncpa [#allocation6], 0 }
   0x6   :  { %23 = vsyncpa [#allocation9], 0  ;;  %s40_s23 = sshll.u32 %s995_s6, 4  ;;  %s678_s24 = smov [#allocation4]   ;;  %s41_s23 = int_to_ptr.hbm [resolvable:$true] %s40_s23 }
   0x7   :  { %s42_s25 = sshll.u32 %s678_s24, 4  ;;  %s679_s26 = smov 128   ;;  %s43_s25 = int_to_ptr.vmem [resolvable:$true] %s42_s25 }
   0x8   :  { %s680_s27 = smov 8  }
   0x9   :  { %48 = dma.hbm_to_vmem [thread:$0]  %s41_s23, 1024, %s43_s25, [#allocation5], %s679_s26, %s679_s26, %s680_s27  }
   0xa   :  { %672 = dma.done.wait [#allocation5], 1024  }
   0xb   :  { %673 = vsyncadd [#allocation5], 4294966272  ;;  %v757_v2 = vld [vmem:[%s990_s0] sm:$0x3]  ;;  %vm63_vm0 = vcmask 1040384   ;;  %v681_v17 = vmov 0   ;;  %v104_v46 = vlaneseq }
   0xc   :  { %v56_v3 = vld [vmem:[%s992_s2] sm:$0x3]  ;;  %593 = vset.pattern.permute.xlu1 %v681_v17  ;;  %594 = vset.pattern.permute.xlu2 %v681_v17  ;;  %v261_v19 = vld [vmem:[#allocation4 + $0x30] sm:$0xff]  ;;  %v260_v21 = vld [vmem:[#allocation4 + $0x28] sm:$0xff]  ;;  %vm91_vm1 = vcmask 0   ;;  %s488_s15 = sshll.u32 %s999_s10, 4  ;;  %s489_s15 = int_to_ptr.hbm [resolvable:$true] %s488_s15 }
   0xd   :  { %v71_v4 = vld [vmem:[%s993_s3] sm:$0x3]  ;;  %v57_v5 = vmul.f32 %v56_v3, %v757_v2  ;;  %595 = vset.pattern.permute.xlu0 %v681_v17  ;;  %v259_v24 = vld [vmem:[#allocation4 + $0x20] sm:$0xff]  ;;  %v257_v43 = vld [vmem:[#allocation4 + $0x10] sm:$0xff]  ;;  %v772_v47 = vshrl.u32 %v104_v46, 7  ;;  %v775_v48 = vand.u32 127, %v104_v46 }
   0xe   :  { %v72_v6 = vmul.f32 %v71_v4, %v757_v2  ;;  %v262_v18 = vld [vmem:[#allocation4 + $0x38] sm:$0xff]  ;;  %v256_v44 = vld [vmem:[#allocation4 + $0x8] sm:$0xff]  ;;  %v255_v45 = vld [vmem:[#allocation4] sm:$0xff]  ;;  %s683_s16 = smov [#allocation7]   ;;  %s684_s18 = smov [#allocation8]  }
   0xf   :  { %v59_v7 = vperm.slane %v57_v5, 0  ;;  %v60_v8 = vperm.slane %v57_v5, 1  ;;  %v69_v20 = vld [vmem:[#allocation2] sm:$0x1]  ;;  %276 = vmatpush.msra.mxu2 %v262_v18  ;;  %v83_v28 = vld [vmem:[#allocation3] sm:$0x1] }
  0x10   :  { %v74_v11 = vperm.slane %v72_v6, 0  ;;  %v75_v12 = vperm.slane %v72_v6, 1  ;;  %v258_v26 = vld [vmem:[#allocation4 + $0x18] sm:$0xff]  ;;  %v778_v49 = vadd.s32 56, %v772_v47  ;;  %v781_v50 = vadd.s32 48, %v772_v47  ;;  %s486_s17 = sshll.u32 %s683_s16, 4  ;;  %s487_s17 = int_to_ptr.vmem [resolvable:$true] %s486_s17 }
  0x11   :  { %v64_v9 = vsel %vm63_vm0, %v59_v7, 0.0  ;;  %v65_v10 = vsel %vm63_vm0, %v60_v8, 0.0  ;;  %277 = vmatpush.msra.mxu2 %v261_v19  ;;  %v784_v51 = vadd.s32 40, %v772_v47  ;;  %v139_v52 = vshra.s32 %v775_v48, 3  ;;  %s497_s19 = sshll.u32 %s684_s18, 4  ;;  %s499_s22 = sshll.u32 %s1000_s11, 4  ;;  %s498_s19 = int_to_ptr.vmem [resolvable:$true] %s497_s19  ;;  %s500_s22 = int_to_ptr.hbm [resolvable:$true] %s499_s22 }
  0x12   :  { %v66_v13 = vadd.f32 %v65_v10, %v64_v9  ;;  %v78_v14 = vsel %vm63_vm0, %v74_v11, 0.0  ;;  %v79_v15 = vsel %vm63_vm0, %v75_v12, 0.0  ;;  %v318_v53 = vshra.s32 %v778_v49, 3 }
  0x13   :  { %v80_v16 = vadd.f32 %v79_v15, %v78_v14  ;;  %278 = vmatpush.msra.mxu2 %v260_v21  ;;  %v317_v54 = vshra.s32 %v781_v50, 3  ;;  %v316_v55 = vshra.s32 %v784_v51, 3  ;;  %v791_v56 = vadd.s32 32, %v772_v47 }
  0x14   :  { %67 = vadd.xlane.f32.xlu0 %v66_v13  ;;  %v140_v57 = vmul.u32 16, %v139_v52  ;;  %v141_v58 = vand.u32 7, %v775_v48  ;;  %v795_v59 = vadd.s32 24, %v772_v47  ;;  %v326_v60 = vmul.u32 16, %v318_v53 }
  0x15   :  { %279 = vmatpush.msra.mxu2 %v259_v24  ;;  %v334_v61 = vand.u32 7, %v778_v49  ;;  %v325_v62 = vmul.u32 16, %v317_v54  ;;  %v333_v63 = vand.u32 7, %v781_v50  ;;  %v324_v0 = vmul.u32 16, %v316_v55 }
  0x16   :  { %v332_v1 = vand.u32 7, %v784_v51  ;;  %v315_v3 = vshra.s32 %v791_v56, 3  ;;  %v802_v4 = vadd.s32 16, %v772_v47  ;;  %v805_v5 = vadd.s32 8, %v772_v47 }
  0x17   :  { %280 = vmatpush.msra.mxu2 %v258_v26  ;;  %v142_v6 = vadd.s32 %v141_v58, %v140_v57  ;;  %v314_v7 = vshra.s32 %v795_v59, 3  ;;  %v120_v8 = vadd.s32 120, %v772_v47  ;;  %v136_v9 = vadd.s32 248, %v772_v47 }
  0x18   :  { %v342_v10 = vadd.s32 %v334_v61, %v326_v60  ;;  %v341_v11 = vadd.s32 %v333_v63, %v325_v62  ;;  %v811_v12 = vadd.s32 128, %v775_v48  ;;  %v340_v13 = vadd.s32 %v332_v1, %v324_v0 }
  0x19   :  { %281 = vmatpush.msra.mxu2 %v257_v43  ;;  %v323_v14 = vmul.u32 16, %v315_v3  ;;  %v313_v15 = vshra.s32 %v802_v4, 3  ;;  %v135_v17 = vadd.s32 240, %v772_v47  ;;  %v331_v18 = vand.u32 7, %v791_v56 }
  0x1a   :  { %v312_v19 = vshra.s32 %v805_v5, 3  ;;  %v134_v21 = vadd.s32 232, %v772_v47  ;;  %v117_v24 = vadd.s32 96, %v772_v47  ;;  %v329_v26 = vand.u32 7, %v802_v4 }
  0x1b   :  { %282 = vmatpush.msra.mxu2 %v256_v44  ;;  %v116_v43 = vadd.s32 88, %v772_v47  ;;  %v132_v44 = vadd.s32 216, %v772_v47  ;;  %v115_v53 = vadd.s32 80, %v772_v47  ;;  %v131_v54 = vadd.s32 208, %v772_v47 }
  0x1c   :  { %81 = vadd.xlane.f32.xlu0 %v80_v16  ;;  %v119_v16 = vadd.s32 112, %v772_v47  ;;  %v114_v58 = vadd.s32 72, %v772_v47  ;;  %v130_v60 = vadd.s32 200, %v772_v47  ;;  %v113_v62 = vadd.s32 64, %v772_v47 }
  0x1d   :  { %283 = vmatpush.msra.mxu2 %v255_v45  ;;  %v129_v63 = vadd.s32 192, %v772_v47  ;;  %v128_v1 = vadd.s32 184, %v772_v47  ;;  %v127_v3 = vadd.s32 176, %v772_v47 }
  0x87   :  { %v68_v22 = vpop.xlane.xlu0 %67 }
  0x88   :  { %v70_v23 = vadd.f32 %v69_v20, %v68_v22  ;;  %v118_v20 = vadd.s32 104, %v772_v47  ;;  %v322_v22 = vmul.u32 16, %v314_v7  ;;  %v125_v7 = vadd.s32 160, %v772_v47 }
  0x8a   :  { %v85_v25 = vmax.f32 %v70_v23, 0.0 }
  0x8c   :  { %v86_v27 = vmul.f32 8.0, %v85_v25  ;;  %v330_v25 = vand.u32 7, %v795_v59 }
  0x8e   :  { %v572_v29 = vcvt.f32.s32 %v86_v27 }
  0x8f   :  { %v82_v30 = vpop.xlane.xlu0 %81 }
  0x90   :  { %v84_v31 = vadd.f32 %v83_v28, %v82_v30  ;;  %vm94_vm2 = vcmp.gt.s32.totalorder %v572_v29, 0  ;;  %92 = vst.msk [vmem:[#allocation7] sm:$0x1] %vm91_vm1, %v572_v29  ;;  %v311_v30 = vshra.s32 %v772_v47, 3 }
  0x91   :  { %v95_v32 = vsel %vm94_vm2, %v572_v29, 0  ;;  %v321_v29 = vmul.u32 16, %v313_v15  ;;  %491 = dma.vmem_to_hbm [thread:$0]  %s487_s17, 16, %s489_s15, [#allocation6]  }
  0x92   :  { %v87_v33 = vmax.f32 %v84_v31, 0.0  ;;  %vm96_vm3 = vcmp.lt.s32.totalorder %v95_v32, 8 }
  0x93   :  { %v97_v34 = vsel %vm96_vm3, %v95_v32, 8  ;;  %v339_v32 = vadd.s32 %v331_v18, %v323_v14 }
  0x94   :  { %v88_v35 = vmul.f32 8.0, %v87_v33  ;;  %431 = vperm.xlu1 %593, %v97_v34   ;;  %v435_v38 = vadd.s32 8, %v97_v34  ;;  %v102_v39 = vmul.u32 16, %v97_v34  ;;  %v320_v33 = vmul.u32 16, %v312_v19 }
  0x95   :  { %v328_v34 = vand.u32 7, %v805_v5 }
  0x96   :  { %v575_v36 = vcvt.f32.s32 %v88_v35  ;;  %v682_v35 = vmov 1.0  }
  0x97   :  { %v336_v45 = vadd.s32 %v328_v34, %v320_v33 }
  0x98   :  { %vm98_vm4 = vcmp.gt.s32.totalorder %v575_v36, 0  ;;  %93 = vst.msk [vmem:[#allocation8] sm:$0x1] %vm91_vm1, %v575_v36 }
  0x99   :  { %v99_v37 = vsel %vm98_vm4, %v575_v36, 0  ;;  %502 = dma.vmem_to_hbm [thread:$0]  %s498_s19, 16, %s500_s22, [#allocation9]  }
  0x9a   :  { %vm100_vm5 = vcmp.lt.s32.totalorder %v99_v37, 8 }
  0x9b   :  { %v101_v40 = vsel %vm100_vm5, %v99_v37, 8  ;;  %v133_v37 = vadd.s32 224, %v772_v47 }
  0x9c   :  { %437 = vperm.xlu1 %593, %v435_v38   ;;  %444 = vperm.xlu2 %594, %v101_v40   ;;  %v103_v41 = vadd.s32 %v102_v39, %v101_v40  ;;  %v450_v42 = vadd.s32 8, %v101_v40  ;;  %v338_v38 = vadd.s32 %v330_v25, %v322_v22  ;;  %v327_v39 = vand.u32 7, %v772_v47 }
  0x9d   :  { %v337_v40 = vadd.s32 %v329_v26, %v321_v29 }
  0x9e   :  { %576 = vpush %v103_v41  ;;  %v319_v41 = vmul.u32 16, %v311_v30 }
  0xa0   :  { %v335_v55 = vadd.s32 %v327_v39, %v319_v41  ;;  %v429_v39 = vand.u32 15, %v811_v12  ;;  %v428_v41 = vand.u32 15, %v775_v48 }
  0xa4   :  { %452 = vperm.xlu2 %594, %v450_v42  }
  0xcf   :  { %s577_s0 = spop %576 }
  0xd0   :  { %v820_v23 = vstv %s577_s0 }
  0xd1   :  { %v826_v27 = vadd.s32 %v820_v23, %v142_v6  ;;  %v350_v28 = vadd.s32 %v342_v10, %v820_v23  ;;  %v349_v31 = vadd.s32 %v341_v11, %v820_v23  ;;  %v348_v36 = vadd.s32 %v340_v13, %v820_v23  ;;  %v263_v10 = vld [vmem:[%s996_s7] sm:$0x1] }
  0xd2   :  { %v347_v42 = vadd.s32 %v339_v32, %v820_v23  ;;  %v346_v52 = vadd.s32 %v338_v38, %v820_v23  ;;  %v345_v57 = vadd.s32 %v337_v40, %v820_v23  ;;  %v344_v61 = vadd.s32 %v336_v45, %v820_v23 }
  0xd3   :  { %vm161_vm6 = vcmp.eq.s32.totalorder %v120_v8, %v826_v27  ;;  %vm177_vm7 = vcmp.eq.s32.totalorder %v136_v9, %v826_v27  ;;  %vm365_vm8 = vcmp.eq.s32.totalorder %v775_v48, %v350_v28  ;;  %vm366_vm9 = vcmp.eq.s32.totalorder %v811_v12, %v350_v28 }
  0xd4   :  { %518 = vmatpush.msk.msra.mxu0 %vm161_vm6, %v682_v35  ;;  %534 = vmatpush.msk.msra.mxu1 %vm177_vm7, %v682_v35  ;;  %vm160_vm10 = vcmp.eq.s32.totalorder %v119_v16, %v826_v27  ;;  %vm176_vm11 = vcmp.eq.s32.totalorder %v135_v17, %v826_v27  ;;  %vm363_vm12 = vcmp.eq.s32.totalorder %v775_v48, %v349_v31  ;;  %v126_v6 = vadd.s32 168, %v772_v47 }
  0xd5   :  { %552 = vmatpush.msk.msra.mxu3 %vm365_vm8, %v682_v35  ;;  %561 = vmatpush.msk.msrb.mxu2 %vm366_vm9, %v682_v35  ;;  %vm364_vm13 = vcmp.eq.s32.totalorder %v811_v12, %v349_v31  ;;  %vm159_vm14 = vcmp.eq.s32.totalorder %v118_v20, %v826_v27  ;;  %vm175_vm15 = vcmp.eq.s32.totalorder %v134_v21, %v826_v27  ;;  %v212_v8 = vperm.slane %v757_v2, 1 }
  0xd6   :  { %519 = vmatpush.msk.msra.mxu0 %vm160_vm10, %v682_v35  ;;  %535 = vmatpush.msk.msra.mxu1 %vm176_vm11, %v682_v35  ;;  %vm361_vm1 = vcmp.eq.s32.totalorder %v775_v48, %v348_v36  ;;  %vm362_vm2 = vcmp.eq.s32.totalorder %v811_v12, %v348_v36  ;;  %vm158_vm3 = vcmp.eq.s32.totalorder %v117_v24, %v826_v27  ;;  %v427_v36 = vshra.s32 %v811_v12, 4 }
  0xd7   :  { %553 = vmatpush.msk.msra.mxu3 %vm363_vm12, %v682_v35  ;;  %562 = vmatpush.msk.msrb.mxu2 %vm364_vm13, %v682_v35  ;;  %vm174_vm4 = vcmp.eq.s32.totalorder %v133_v37, %v826_v27  ;;  %vm359_vm5 = vcmp.eq.s32.totalorder %v775_v48, %v347_v42  ;;  %vm360_vm6 = vcmp.eq.s32.totalorder %v811_v12, %v347_v42  ;;  %v458_v37 = vld [vmem:[%s991_s1] sm:$0x3]  ;;  %v426_v38 = vshra.s32 %v775_v48, 4 }
  0xd8   :  { %520 = vmatpush.msk.msra.mxu0 %vm159_vm14, %v682_v35  ;;  %536 = vmatpush.msk.msra.mxu1 %vm175_vm15, %v682_v35  ;;  %vm157_vm7 = vcmp.eq.s32.totalorder %v116_v43, %v826_v27  ;;  %vm173_vm8 = vcmp.eq.s32.totalorder %v132_v44, %v826_v27  ;;  %vm357_vm9 = vcmp.eq.s32.totalorder %v775_v48, %v346_v52 }
  0xd9   :  { %554 = vmatpush.msk.msra.mxu3 %vm361_vm1, %v682_v35  ;;  %563 = vmatpush.msk.msrb.mxu2 %vm362_vm2, %v682_v35  ;;  %vm358_vm10 = vcmp.eq.s32.totalorder %v811_v12, %v346_v52  ;;  %vm156_vm11 = vcmp.eq.s32.totalorder %v115_v53, %v826_v27  ;;  %vm172_vm12 = vcmp.eq.s32.totalorder %v131_v54, %v826_v27 }
  0xda   :  { %521 = vmatpush.msk.msra.mxu0 %vm158_vm3, %v682_v35  ;;  %537 = vmatpush.msk.msra.mxu1 %vm174_vm4, %v682_v35  ;;  %vm355_vm13 = vcmp.eq.s32.totalorder %v775_v48, %v345_v57  ;;  %vm356_vm14 = vcmp.eq.s32.totalorder %v811_v12, %v345_v57  ;;  %v343_v0 = vadd.s32 %v335_v55, %v820_v23 }
  0xdb   :  { %555 = vmatpush.msk.msra.mxu3 %vm359_vm5, %v682_v35  ;;  %564 = vmatpush.msk.msrb.mxu2 %vm360_vm6, %v682_v35  ;;  %vm155_vm15 = vcmp.eq.s32.totalorder %v114_v58, %v826_v27  ;;  %vm171_vm1 = vcmp.eq.s32.totalorder %v130_v60, %v826_v27  ;;  %vm353_vm2 = vcmp.eq.s32.totalorder %v775_v48, %v344_v61 }
  0xdc   :  { %522 = vmatpush.msk.msra.mxu0 %vm157_vm7, %v682_v35  ;;  %538 = vmatpush.msk.msra.mxu1 %vm173_vm8, %v682_v35  ;;  %vm354_vm3 = vcmp.eq.s32.totalorder %v811_v12, %v344_v61  ;;  %vm154_vm4 = vcmp.eq.s32.totalorder %v113_v62, %v826_v27  ;;  %vm170_vm5 = vcmp.eq.s32.totalorder %v129_v63, %v826_v27 }
  0xdd   :  { %556 = vmatpush.msk.msra.mxu3 %vm357_vm9, %v682_v35  ;;  %565 = vmatpush.msk.msrb.mxu2 %vm358_vm10, %v682_v35  ;;  %vm351_vm6 = vcmp.eq.s32.totalorder %v775_v48, %v343_v0  ;;  %vm352_vm7 = vcmp.eq.s32.totalorder %v811_v12, %v343_v0  ;;  %vm153_vm8 = vcmp.eq.s32.totalorder %v778_v49, %v826_v27  ;;  %v124_v49 = vadd.s32 152, %v772_v47 }
  0xde   :  { %523 = vmatpush.msk.msra.mxu0 %vm156_vm11, %v682_v35  ;;  %539 = vmatpush.msk.msra.mxu1 %vm172_vm12, %v682_v35  ;;  %vm169_vm9 = vcmp.eq.s32.totalorder %v128_v1, %v826_v27  ;;  %vm152_vm10 = vcmp.eq.s32.totalorder %v781_v50, %v826_v27  ;;  %vm168_vm11 = vcmp.eq.s32.totalorder %v127_v3, %v826_v27  ;;  %v123_v50 = vadd.s32 144, %v772_v47 }
  0xdf   :  { %557 = vmatpush.msk.msra.mxu3 %vm355_vm13, %v682_v35  ;;  %566 = vmatpush.msk.msrb.mxu2 %vm356_vm14, %v682_v35  ;;  %vm151_vm12 = vcmp.eq.s32.totalorder %v784_v51, %v826_v27  ;;  %vm167_vm13 = vcmp.eq.s32.totalorder %v126_v6, %v826_v27  ;;  %vm150_vm14 = vcmp.eq.s32.totalorder %v791_v56, %v826_v27  ;;  %v122_v51 = vadd.s32 136, %v772_v47 }
  0xe0   :  { %524 = vmatpush.msk.msra.mxu0 %vm155_vm15, %v682_v35  ;;  %540 = vmatpush.msk.msra.mxu1 %vm171_vm1, %v682_v35  ;;  %vm166_vm15 = vcmp.eq.s32.totalorder %v125_v7, %v826_v27  ;;  %vm149_vm1 = vcmp.eq.s32.totalorder %v795_v59, %v826_v27  ;;  %v121_v56 = vadd.s32 128, %v772_v47  ;;  %v211_v59 = vperm.slane %v757_v2, 0 }
  0xe1   :  { %558 = vmatpush.msk.msra.mxu3 %vm353_vm2, %v682_v35  ;;  %567 = vmatpush.msk.msrb.mxu2 %vm354_vm3, %v682_v35  ;;  %vm165_vm2 = vcmp.eq.s32.totalorder %v124_v49, %v826_v27  ;;  %vm148_vm3 = vcmp.eq.s32.totalorder %v802_v4, %v826_v27  ;;  %v459_v40 = vmul.f32 %v458_v37, %v757_v2 }
  0xe2   :  { %525 = vmatpush.msk.msra.mxu0 %vm154_vm4, %v682_v35  ;;  %541 = vmatpush.msk.msra.mxu1 %vm170_vm5, %v682_v35  ;;  %vm164_vm4 = vcmp.eq.s32.totalorder %v123_v50, %v826_v27  ;;  %vm147_vm5 = vcmp.eq.s32.totalorder %v805_v5, %v826_v27 }
  0xe3   :  { %559 = vmatpush.msk.msra.mxu3 %vm351_vm6, %v682_v35  ;;  %568 = vmatpush.msk.msrb.mxu2 %vm352_vm7, %v682_v35  ;;  %vm163_vm6 = vcmp.eq.s32.totalorder %v122_v51, %v826_v27  ;;  %vm146_vm7 = vcmp.eq.s32.totalorder %v772_v47, %v826_v27  ;;  %v462_v43 = vperm.slane %v459_v40, 1  ;;  %v461_v44 = vperm.slane %v459_v40, 0 }
  0xe4   :  { %526 = vmatpush.msk.msra.mxu0 %vm153_vm8, %v682_v35  ;;  %542 = vmatpush.msk.msra.mxu1 %vm169_vm9, %v682_v35  ;;  %vm162_vm8 = vcmp.eq.s32.totalorder %v121_v56, %v826_v27  ;;  %vm264_vm9 = vcmask 523264  }
  0xe6   :  { %527 = vmatpush.msk.msra.mxu0 %vm152_vm10, %v682_v35  ;;  %543 = vmatpush.msk.msra.mxu1 %vm168_vm11, %v682_v35 }
  0xe8   :  { %528 = vmatpush.msk.msra.mxu0 %vm151_vm12, %v682_v35  ;;  %544 = vmatpush.msk.msra.mxu1 %vm167_vm13, %v682_v35 }
  0xea   :  { %529 = vmatpush.msk.msra.mxu0 %vm150_vm14, %v682_v35  ;;  %545 = vmatpush.msk.msra.mxu1 %vm166_vm15, %v682_v35  ;;  %vm308_vm14 = vcmask 516096  }
  0xec   :  { %530 = vmatpush.msk.msra.mxu0 %vm149_vm1, %v682_v35  ;;  %546 = vmatpush.msk.msra.mxu1 %vm165_vm2, %v682_v35 }
  0xee   :  { %531 = vmatpush.msk.msra.mxu0 %vm148_vm3, %v682_v35  ;;  %547 = vmatpush.msk.msra.mxu1 %vm164_vm4, %v682_v35 }
  0xf0   :  { %532 = vmatpush.msk.msra.mxu0 %vm147_vm5, %v682_v35  ;;  %548 = vmatpush.msk.msra.mxu1 %vm163_vm6, %v682_v35 }
  0xf2   :  { %533 = vmatpush.msk.msra.mxu0 %vm146_vm7, %v682_v35  ;;  %549 = vmatpush.msk.msra.mxu1 %vm162_vm8, %v682_v35 }
  0xf3   :  { %231 = vmatmul.f32.vlgmr.msra.gmra.mxu0 %v211_v59  ;;  %251 = vmatmul.f32.vlgmr.msra.gmra.mxu1 %v212_v8 }
  0xf6   :  { %v445_v34 = vpop.permute.xlu2 %444 }
  0xf7   :  { %vm447_vm6 = vcmp.ge.s32.totalorder %v429_v39, %v445_v34 }
  0xfe   :  { %v453_v42 = vpop.permute.xlu2 %452 }
 0x106   :  { %v432_v33 = vpop.permute.xlu1 %431 }
 0x107   :  { %vm434_vm2 = vcmp.ge.s32.totalorder %v427_v36, %v432_v33  ;;  %vm433_vm5 = vcmp.ge.s32.totalorder %v426_v38, %v432_v33 }
 0x10e   :  { %v438_v35 = vpop.permute.xlu1 %437 }
 0x10f   :  { %vm440_vm1 = vcmp.lt.s32.totalorder %v427_v36, %v438_v35  ;;  %vm439_vm3 = vcmp.lt.s32.totalorder %v426_v38, %v438_v35 }
 0x110   :  { %vm442_vm4 = vmand %vm434_vm2, %vm440_vm1 }
 0x111   :  { %vm441_vm7 = vmand %vm433_vm5, %vm439_vm3 }
 0x112   :  { %vm449_vm8 = vmand %vm442_vm4, %vm447_vm6 }
 0x170   :  { %v232_v4 = vpop.f32.mrf.mxu0  ;;  %v252_v5 = vpop.f32.mrf.mxu1 }
 0x171   :  { %v253_v9 = vadd.f32 %v252_v5, %v232_v4 }
 0x173   :  { %550 = vmatmul.msk.f32.vlgmr.msra.gmra.mxu2 %vm264_vm9, %v253_v9 }
 0x1f6   :  { %v285_v11 = vpop.f32.mrf.mxu2 }
 0x1f7   :  { %v286_v47 = vadd.f32 %v285_v11, %v263_v10 }
 0x1f9   :  { %v551_v13 = vmul.f32 -1.442695, %v286_v47 }
 0x1fb   :  { %596 = vpow2.f32 %v551_v13 }
 0x201   :  { %v597_v14 = vpop.eup %596 }
 0x202   :  { %v291_v15 = vadd.f32 1.0, %v597_v14 }
 0x204   :  { %598 = vrcp.f32 %v291_v15  ;;  %v303_v19 = vand.u32 2147483648, %v291_v15  ;;  %v301_v21 = vand.u32 2147483647, %v291_v15  ;;  %vm297_vm11 = vweird.f32 %v291_v15 }
 0x206   :  { %v304_v23 = vor.u32 1.1754944e-38, %v303_v19  ;;  %vm302_vm13 = vcmp.eq.f32.partialorder %v301_v21, 8.507059e+37 }
 0x20a   :  { %v599_v16 = vpop.eup %598 }
 0x20b   :  { %v293_v17 = vmul.f32 %v599_v16, %v291_v15  ;;  %vm298_vm10 = vweird.f32 %v599_v16 }
 0x20c   :  { %vm299_vm12 = vmor %vm297_vm11, %vm298_vm10  ;;  %vm455_vm10 = vcmp.lt.s32.totalorder %v429_v39, %v453_v42 }
 0x20d   :  { %v294_v18 = vsub.f32 1.0, %v293_v17 }
 0x20f   :  { %v295_v20 = vmul.f32 %v599_v16, %v294_v18 }
 0x211   :  { %v296_v22 = vadd.f32 %v599_v16, %v295_v20 }
 0x213   :  { %v300_v24 = vsel %vm299_vm12, %v599_v16, %v296_v22  ;;  %vm457_vm12 = vmand %vm449_vm8, %vm455_vm10 }
 0x214   :  { %v305_v25 = vsel %vm302_vm13, %v304_v23, %v300_v24  ;;  %vm454_vm13 = vcmp.lt.s32.totalorder %v428_v41, %v453_v42 }
 0x215   :  { %v580_v26 = vcvt.f32.s32 %v305_v25  ;;  %v578_v28 = vand.u32 2147483647, %v305_v25  ;;  %v583_v30 = vand.u32 2147483648, %v305_v25 }
 0x217   :  { %v581_v27 = vcvt.s32.f32 %v580_v26  ;;  %vm579_vm15 = vcmp.lt.f32.partialorder %v578_v28, 8388608.0 }
 0x219   :  { %v582_v29 = vand.u32 2147483647, %v581_v27 }
 0x21b   :  { %v584_v31 = vor.u32 %v583_v30, %v582_v29 }
 0x21d   :  { %v585_v32 = vsel %vm579_vm15, %v584_v31, %v305_v25  ;;  %vm474_vm15 = vcmp.lt.s32.totalorder %v104_v46, 256 }
 0x21e   :  { %309 = vst.msk [vmem:[%s998_s9] sm:$0x1] %vm308_vm14, %v585_v32  ;;  %560 = vmatmul.msk.f32.vlgmr.msra.gmra.mxu3 %vm264_vm9, %v585_v32  ;;  %569 = vmatmul.msk.f32.vlgmr.msrb.gmra.mxu2 %vm264_vm9, %v585_v32  ;;  %vm446_vm9 = vcmp.ge.s32.totalorder %v428_v41, %v445_v34 }
 0x21f   :  { %vm448_vm11 = vmand %vm441_vm7, %vm446_vm9 }
 0x220   :  { %vm456_vm14 = vmand %vm448_vm11, %vm454_vm13 }
 0x2a1   :  { %v403_v45 = vpop.f32.mrf.mxu3  ;;  %v423_v12 = vpop.f32.mrf.mxu2 }
 0x2a2   :  { %v466_v52 = vsel %vm457_vm12, %v423_v12, %v462_v43  ;;  %v465_v48 = vsel %vm456_vm14, %v403_v45, %v461_v44 }
 0x2a3   :  { %v469_v2 = vrot.slane %v466_v52, 7 }
 0x2a5   :  { %v470_v53 = vsel %vm63_vm0, %v465_v48, %v469_v2 }
 0x2a6   :  { %476 = vst.msk [vmem:[%s997_s8] sm:$0x3] %vm474_vm15, %v470_v53 }
 0x2a7   :  { %674 = dma.done.wait [#allocation6], 16  }
 0x2a8   :  { %675 = vsyncadd [#allocation6], 4294967280 }
 0x2a9   :  { %676 = dma.done.wait [#allocation9], 16  }
 0x2aa   :  { %677 = vsyncadd [#allocation9], 4294967280 }
 0x2ab   :  { %515 = vsyncpa [#allocation5], 1 }
 0x2ac   :  { %516 = vsyncpa [#allocation6], 1 }
 0x2ad   :  { %517 = vsyncpa [#allocation9], 1 }

</bundles_post_ra>
